<compile_context>
chip_gen: v7x
topology: tpu7x:2x2x1
jax: 0.10.0
libtpu: 0.0.40
codegen_flags: <defaults>
</compile_context>

<pallas_src>
import functools

import jax
import jax.numpy as jnp
from jax.experimental import pallas as pl
from jax.experimental.pallas import tpu as pltpu


def _round_up(v, m):
    return ((v + m - 1) // m) * m


# ---------------- SAGEConv layer (row-tiled): act( inv_deg*(A @ xWl) + x @ Wr + bl ) --------
def _sage_kernel(a_ref, inv_deg_ref, x_ref, xwl_ref, wr_ref, bl_ref, o_ref, *, apply_sigmoid):
    # int8 0/1 edge counts -> exact bf16 cast, single MXU matmul against the resident
    # (N, Fout) xWl (reassociated (A@x)@Wl == A@(x@Wl)); degree scaling applied in f32.
    a = a_ref[...].astype(jnp.bfloat16)                                     # (TM, N)
    agg = jnp.dot(a, xwl_ref[...], preferred_element_type=jnp.float32)      # (TM, Fout)
    self_t = jnp.dot(x_ref[...].astype(jnp.float32), wr_ref[...],
                     preferred_element_type=jnp.float32)                    # (TM, Fout)
    out = agg * inv_deg_ref[...] + self_t + bl_ref[...]
    if apply_sigmoid:
        out = jax.nn.sigmoid(out)
    o_ref[...] = out.astype(o_ref.dtype)


def sage_layer(a_i8, inv_deg, x_bf16, xwl_bf16, wr, bl, apply_sigmoid, tile, out_dtype):
    n_pad = a_i8.shape[0]
    fin = x_bf16.shape[1]
    fout = xwl_bf16.shape[1]
    # Scoped-VMEM budget: the double-buffered int8 A slab dominates.  Clamp to
    # [32 MiB, 64 MiB] -> safe above v5e's 16 MiB default, within v7x's 64 MiB physical.
    need = (2 * tile * n_pad                       # A row slab (int8), double buffered
            + 2 * n_pad * fout * 2                 # resident xWl (bf16)
            + 2 * tile * (2 * fin + 4)             # x tile (bf16) + inv_deg (f32)
            + 2 * tile * fout * 8                  # output tiles
            + (4 << 20))                           # headroom
    vmem_limit = int(min(max(need, 32 << 20), 64 << 20))

    kern = functools.partial(_sage_kernel, apply_sigmoid=apply_sigmoid)
    return pl.pallas_call(
        kern,
        out_shape=jax.ShapeDtypeStruct((n_pad, fout), out_dtype),
        grid_spec=pltpu.PrefetchScalarGridSpec(
            num_scalar_prefetch=0,
            grid=(n_pad // tile,),
            in_specs=[
                pl.BlockSpec((tile, n_pad), lambda i: (i, 0)),    # A row-slab, int8
                pl.BlockSpec((tile, 1), lambda i: (i, 0)),        # 1/deg column, f32
                pl.BlockSpec((tile, fin), lambda i: (i, 0)),      # self rows, bf16
                pl.BlockSpec((n_pad, fout), lambda i: (0, 0)),    # xWl (resident, bf16, tiny)
                pl.BlockSpec((fin, fout), lambda i: (0, 0)),      # Wr (resident)
                pl.BlockSpec((1, fout), lambda i: (0, 0)),        # bl (resident)
            ],
            out_specs=pl.BlockSpec((tile, fout), lambda i: (i, 0)),
        ),
        compiler_params=pltpu.CompilerParams(
            dimension_semantics=("parallel",),
            vmem_limit_bytes=vmem_limit),
    )(a_i8, inv_deg, x_bf16, xwl_bf16, wr, bl)


# ---------------- GlobalAttention pooling: tiled online-softmax over node tiles ------------
def _att_pool_kernel(nb_ref, x_ref, wg_ref, bg_ref, o_ref, m_sc, l_sc, acc_sc, *, num_graphs):
    i = pl.program_id(0)

    @pl.when(i == 0)
    def _():
        m_sc[...] = jnp.full_like(m_sc, -1e30)
        l_sc[...] = jnp.zeros_like(l_sc)
        acc_sc[...] = jnp.zeros_like(acc_sc)

    x = x_ref[...]                                                           # (TM, F) f32
    tm = x.shape[0]
    gate = jnp.dot(x, wg_ref[...], preferred_element_type=jnp.float32) + bg_ref[...]  # (TM, 1)

    # int32 membership mask built directly in (TM, B) orientation: the (TM, 1) gate and
    # node-id column broadcast against it with no per-step cast or transpose.
    member = jax.lax.broadcasted_iota(jnp.int32, (tm, num_graphs), 1) == nb_ref[...]   # (TM, B)
    member_f = member.astype(jnp.float32)

    scores = jnp.where(member, gate, -1e30)                                  # (TM, B)
    tile_max = jnp.max(scores, axis=0, keepdims=True)                        # (1, B)
    m_new = jnp.maximum(m_sc[...], tile_max)
    scale = jnp.exp(m_sc[...] - m_new)                                       # (1, B)
    p = jnp.exp(scores - m_new) * member_f                                   # (TM, B)
    l_sc[...] = scale * l_sc[...] + jnp.sum(p, axis=0, keepdims=True)
    # acc kept as (F, B) so the (1, B) rescale broadcasts; contraction over the node axis
    # (dim 0 of both operands) avoids materialising a transpose in the hot loop.
    acc_sc[...] = scale * acc_sc[...] + jax.lax.dot_general(
        x, p, (((0,), (0,)), ((), ())), preferred_element_type=jnp.float32)  # (F, B)
    m_sc[...] = m_new

    @pl.when(i == pl.num_programs(0) - 1)
    def _():
        # Guarded denominator: a graph with no member nodes yields 0, not NaN.
        o_ref[...] = jnp.transpose(acc_sc[...] / jnp.maximum(l_sc[...], 1e-20))


def att_pool(node_graph_id, node_feats, gate_w, gate_b, num_graphs, tile):
    n_pad, f = node_feats.shape
    kern = functools.partial(_att_pool_kernel, num_graphs=num_graphs)
    return pl.pallas_call(
        kern,
        out_shape=jax.ShapeDtypeStruct((num_graphs, f), jnp.float32),
        grid_spec=pltpu.PrefetchScalarGridSpec(
            num_scalar_prefetch=0,
            grid=(n_pad // tile,),
            in_specs=[
                pl.BlockSpec((tile, 1), lambda i: (i, 0)),       # graph id per node (int32)
                pl.BlockSpec((tile, f), lambda i: (i, 0)),       # node features tile
                pl.BlockSpec((f, 1), lambda i: (0, 0)),          # gate weight
                pl.BlockSpec((1, 1), lambda i: (0, 0)),          # gate bias
            ],
            out_specs=pl.BlockSpec((num_graphs, f), lambda i: (0, 0)),
            scratch_shapes=[
                pltpu.VMEM((1, num_graphs), jnp.float32),        # running max
                pltpu.VMEM((1, num_graphs), jnp.float32),        # running sum
                pltpu.VMEM((f, num_graphs), jnp.float32),        # running weighted acc
            ],
        ),
        compiler_params=pltpu.CompilerParams(dimension_semantics=("arbitrary",)),
    )(node_graph_id, node_feats, gate_w, gate_b)


# ---------------- EdgeCNN (1x1 convs) FUSED with per-graph edge mean-pool -------------------
def _edge_kernel(eb_ref, e_ref, w1_ref, b1_ref, w2_ref, b2_ref, o_ref,
                 sum_sc, cnt_sc, *, num_graphs):
    i = pl.program_id(0)

    @pl.when(i == 0)
    def _():
        sum_sc[...] = jnp.zeros_like(sum_sc)
        cnt_sc[...] = jnp.zeros_like(cnt_sc)

    h = jax.nn.sigmoid(
        jnp.dot(e_ref[...], w1_ref[...], preferred_element_type=jnp.float32) + b1_ref[...])
    y = jnp.dot(h, w2_ref[...], preferred_element_type=jnp.float32) + b2_ref[...]    # (TE, Cout)
    te = y.shape[0]

    # Edge graph ids arrive as a (1, TE) int32 row so the (B, TE) mask needs no transpose.
    member_f = (jax.lax.broadcasted_iota(jnp.int32, (num_graphs, te), 0)
                == eb_ref[...]).astype(jnp.float32)                                   # (B, TE)
    sum_sc[...] += jnp.dot(member_f, y, preferred_element_type=jnp.float32)           # (B, Cout)
    cnt_sc[...] += jnp.sum(member_f, axis=1, keepdims=True)                           # (B, 1)

    @pl.when(i == pl.num_programs(0) - 1)
    def _():
        o_ref[...] = sum_sc[...] / jnp.maximum(cnt_sc[...], 1.0)


def edge_cnn_mean_pool(edge_graph_id, edge_attr, w1, b1, w2, b2, num_graphs, tile):
    e_pad, cin = edge_attr.shape
    cmid = w1.shape[1]
    cout = w2.shape[1]
    kern = functools.partial(_edge_kernel, num_graphs=num_graphs)
    return pl.pallas_call(
        kern,
        out_shape=jax.ShapeDtypeStruct((num_graphs, cout), jnp.float32),
        grid_spec=pltpu.PrefetchScalarGridSpec(
            num_scalar_prefetch=0,
            grid=(e_pad // tile,),
            in_specs=[
                pl.BlockSpec((1, tile), lambda i: (0, i)),       # edge -> graph id (int32 row)
                pl.BlockSpec((tile, cin), lambda i: (i, 0)),     # edge_attr tile
                pl.BlockSpec((cin, cmid), lambda i: (0, 0)),
                pl.BlockSpec((1, cmid), lambda i: (0, 0)),
                pl.BlockSpec((cmid, cout), lambda i: (0, 0)),
                pl.BlockSpec((1, cout), lambda i: (0, 0)),
            ],
            out_specs=pl.BlockSpec((num_graphs, cout), lambda i: (0, 0)),
            scratch_shapes=[
                pltpu.VMEM((num_graphs, cout), jnp.float32),     # per-graph sum
                pltpu.VMEM((num_graphs, 1), jnp.float32),        # per-graph edge count
            ],
        ),
        compiler_params=pltpu.CompilerParams(dimension_semantics=("arbitrary",)),
    )(edge_graph_id, edge_attr, w1, b1, w2, b2)


# ---------------- GraphModel.forward ----------------
def graph_model_forward(params, x, edge_index, edge_attr, batch, num_graphs,
                        node_tile=512, edge_tile=1024):
    assert node_tile % 128 == 0 and edge_tile % 128 == 0
    N, fin = x.shape
    E = edge_attr.shape[0]
    src, tgt = edge_index[0], edge_index[1]

    n_pad = _round_up(N, node_tile)
    e_pad = _round_up(E, edge_tile)

    # Adjacency as raw int8 edge counts (1 byte/elem: the dominant HBM stream), built
    # directly in int8 -> no f32/int32 N^2 intermediate.  1/deg applied in f32 in-kernel.
    a_i8 = jnp.zeros((n_pad, n_pad), jnp.int8).at[tgt, src].add(jnp.int8(1))
    deg = jnp.zeros((n_pad,), jnp.float32).at[tgt].add(1.0)
    inv_deg = (1.0 / jnp.maximum(deg, 1.0))[:, None]                     # (n_pad, 1) f32

    x_p = jnp.zeros((n_pad, fin), jnp.float32).at[:N].set(x)
    x_bf = x_p.astype(jnp.bfloat16)

    # NodeGraphSAGE: sigmoid(SAGEConv1) -> SAGEConv2.
    # Reassociation (A@x)@Wl == A@(x@Wl): xWl is a tiny N x Fout matmul done here.
    xwl1 = jnp.dot(x_p, params["sage1_wl"]).astype(jnp.bfloat16)
    h_bf = sage_layer(a_i8, inv_deg, x_bf, xwl1,
                      params["sage1_wr"], params["sage1_bl"],
                      True, node_tile, jnp.bfloat16)                     # bf16 out of kernel

    xwl2 = jnp.dot(h_bf.astype(jnp.float32), params["sage2_wl"]).astype(jnp.bfloat16)
    node_feats = sage_layer(a_i8, inv_deg, h_bf, xwl2,
                            params["sage2_wr"], params["sage2_bl"],
                            False, node_tile, jnp.float32)

    # GlobalAttention pooling; padded nodes get graph id == num_graphs -> masked out.
    nb = jnp.full((n_pad, 1), num_graphs, jnp.int32).at[:N, 0].set(batch.astype(jnp.int32))
    pooled_nodes = att_pool(nb, node_feats, params["gate_w"], params["gate_b"],
                            num_graphs, node_tile)

    # EdgeCNN (two 1x1 convs) fused with global_mean_pool; edge_batch = batch[edge_index[0]].
    edge_attr_p = jnp.zeros((e_pad, edge_attr.shape[1]), jnp.float32).at[:E].set(edge_attr)
    eb = jnp.full((1, e_pad), num_graphs, jnp.int32).at[0, :E].set(batch[src].astype(jnp.int32))
    pooled_edges = edge_cnn_mean_pool(eb, edge_attr_p,
                                      params["ec_w1"], params["ec_b1"],
                                      params["ec_w2"], params["ec_b2"],
                                      num_graphs, edge_tile)

    return jnp.concatenate([pooled_nodes, pooled_edges], axis=-1)


# ---------------- pure-JAX reference for sanity checking ----------------
def reference_forward(params, x, edge_index, edge_attr, batch, num_graphs):
    N = x.shape[0]
    src, tgt = edge_index[0], edge_index[1]

    def sage(xin, wl, bl, wr):
        summ = jnp.zeros((N, xin.shape[1]), jnp.float32).at[tgt].add(xin[src])
        deg = jnp.zeros((N,), jnp.float32).at[tgt].add(1.0)
        agg = summ / jnp.maximum(deg, 1.0)[:, None]
        return agg @ wl + bl + xin @ wr

    h = jax.nn.sigmoid(sage(x, params["sage1_wl"], params["sage1_bl"], params["sage1_wr"]))
    nf = sage(h, params["sage2_wl"], params["sage2_bl"], params["sage2_wr"])

    ef = jax.nn.sigmoid(edge_attr @ params["ec_w1"] + params["ec_b1"])
    ef = ef @ params["ec_w2"] + params["ec_b2"]

    gate = (nf @ params["gate_w"] + params["gate_b"])[:, 0]
    gmax = jax.ops.segment_max(gate, batch, num_segments=num_graphs)
    e = jnp.exp(gate - gmax[batch])
    esum = jax.ops.segment_sum(e, batch, num_segments=num_graphs)
    alpha = e / esum[batch]
    pooled_nodes = jax.ops.segment_sum(alpha[:, None] * nf, batch, num_segments=num_graphs)

    edge_batch = batch[src]
    ecnt = jax.ops.segment_sum(jnp.ones_like(edge_batch, jnp.float32), edge_batch,
                               num_segments=num_graphs)
    pooled_edges = (jax.ops.segment_sum(ef, edge_batch, num_segments=num_graphs)
                    / jnp.maximum(ecnt, 1.0)[:, None])
    return jnp.concatenate([pooled_nodes, pooled_edges], axis=-1)


if __name__ == "__main__":
    # Small, forward-consistent sizes; tiles chosen so every grid has >1 step.
    node_input_dim, node_hidden_dim, node_output_dim = 8, 16, 16
    edge_input_dim, edge_output_dim = 6, 8
    num_graphs = 4
    nodes_per_graph, edges_per_graph = 50, 100
    N = num_graphs * nodes_per_graph              # 200 -> n_pad = 256 with node_tile = 128
    E = num_graphs * edges_per_graph              # 400 -> e_pad = 512 with edge_tile = 256

    key = jax.random.PRNGKey(0)
    keys = jax.random.split(key, 24)

    x = jax.random.normal(keys[0], (N, node_input_dim), jnp.float32)
    edge_attr = jax.random.normal(keys[1], (E, edge_input_dim), jnp.float32)

    src_list, tgt_list = [], []
    for g in range(num_graphs):
        src_list.append(jax.random.randint(keys[2 + g], (edges_per_graph,), 0, nodes_per_graph)
                        + g * nodes_per_graph)
        tgt_list.append(jax.random.randint(keys[6 + g], (edges_per_graph,), 0, nodes_per_graph)
                        + g * nodes_per_graph)
    edge_index = jnp.stack([jnp.concatenate(src_list),
                            jnp.concatenate(tgt_list)]).astype(jnp.int32)
    batch = jnp.repeat(jnp.arange(num_graphs, dtype=jnp.int32), nodes_per_graph)

    # Deterministic parameters (Linear weights pre-transposed as [in, out];
    # Conv1d k=1 weights [C_out, C_in, 1] stored as [C_in, C_out]).
    def w(k, shape):
        return (0.2 * jax.random.normal(k, shape)).astype(jnp.float32)

    params = {
        "sage1_wl": w(keys[10], (node_input_dim, node_hidden_dim)),
        "sage1_bl": w(keys[11], (1, node_hidden_dim)),
        "sage1_wr": w(keys[12], (node_input_dim, node_hidden_dim)),
        "sage2_wl": w(keys[13], (node_hidden_dim, node_output_dim)),
        "sage2_bl": w(keys[14], (1, node_output_dim)),
        "sage2_wr": w(keys[15], (node_hidden_dim, node_output_dim)),
        "ec_w1": w(keys[16], (edge_input_dim, edge_output_dim)),
        "ec_b1": w(keys[17], (1, edge_output_dim)),
        "ec_w2": w(keys[18], (edge_output_dim, edge_output_dim)),
        "ec_b2": w(keys[19], (1, edge_output_dim)),
        "gate_w": w(keys[20], (node_output_dim, 1)),
        "gate_b": w(keys[21], (1, 1)),
    }

    out = graph_model_forward(params, x, edge_index, edge_attr, batch, num_graphs,
                              node_tile=128, edge_tile=256)
    out = jax.block_until_ready(out)

    ref = reference_forward(params, x, edge_index, edge_attr, batch, num_graphs)
    assert out.shape == (num_graphs, node_output_dim + edge_output_dim), out.shape
    # A is exact int8 + f32 degree scaling now; remaining error is bf16 streaming of
    # x / xWl / layer-1 activations (~1e-3 scale).
    assert jnp.allclose(out, ref, atol=3e-2, rtol=3e-2), (out, ref)

    print("KERNEL_OK")
</pallas_src>

<mosaic_0001>
module attributes {stable_mosaic.version = 11 : i64} {
  func.func @_sage_kernel(%arg0: i32, %arg1: memref<128x256xi8, #tpu.memory_space<vmem>>, %arg2: memref<128x1xf32, #tpu.memory_space<vmem>>, %arg3: memref<128x8xbf16, #tpu.memory_space<vmem>>, %arg4: memref<256x16xbf16, #tpu.memory_space<vmem>>, %arg5: memref<8x16xf32, #tpu.memory_space<vmem>>, %arg6: memref<1x16xf32, #tpu.memory_space<vmem>>, %arg7: memref<128x16xbf16, #tpu.memory_space<vmem>>) attributes {dimension_semantics = [#tpu.dimension_semantics<parallel>], iteration_bounds = array<i64: 2>, scalar_prefetch = 0 : i64, scratch_operands = 0 : i64, tpu.core_type = #tpu.core_type<tc>, window_params = [{transform_indices = @transform_0, window_bounds = array<i64: 128, 256>}, {transform_indices = @transform_1, window_bounds = array<i64: 128, 1>}, {transform_indices = @transform_2, window_bounds = array<i64: 128, 8>}, {pipeline_mode = #tpu.pipeline_mode<synchronous>, transform_indices = @transform_3, window_bounds = array<i64: 256, 16>}, {pipeline_mode = #tpu.pipeline_mode<synchronous>, transform_indices = @transform_4, window_bounds = array<i64: 8, 16>}, {pipeline_mode = #tpu.pipeline_mode<synchronous>, transform_indices = @transform_5, window_bounds = array<i64: 1, 16>}, {transform_indices = @transform_6, window_bounds = array<i64: 128, 16>}]} {
    %c0 = arith.constant 0 : index
    %c0_0 = arith.constant 0 : index
    %0 = vector.load %arg1[%c0, %c0_0] : memref<128x256xi8, #tpu.memory_space<vmem>>, vector<128x256xi8>
    %1 = arith.sitofp %0 : vector<128x256xi8> to vector<128x256xbf16>
    %c0_1 = arith.constant 0 : index
    %c0_2 = arith.constant 0 : index
    %2 = vector.load %arg4[%c0_1, %c0_2] : memref<256x16xbf16, #tpu.memory_space<vmem>>, vector<256x16xbf16>
    %cst = arith.constant dense<0.000000e+00> : vector<128x16xf32>
    %3 = tpu.matmul %1, %2, %cst {dimension_numbers = #tpu.dot_dimension_numbers<[1], [0], [0], [1], [0, 0, 1, 1], [], []>} : vector<128x256xbf16>, vector<256x16xbf16>, vector<128x16xf32> -> vector<128x16xf32>
    %c0_3 = arith.constant 0 : index
    %c0_4 = arith.constant 0 : index
    %4 = vector.load %arg3[%c0_3, %c0_4] : memref<128x8xbf16, #tpu.memory_space<vmem>>, vector<128x8xbf16>
    %5 = arith.extf %4 : vector<128x8xbf16> to vector<128x8xf32>
    %c0_5 = arith.constant 0 : index
    %c0_6 = arith.constant 0 : index
    %6 = vector.load %arg5[%c0_5, %c0_6] : memref<8x16xf32, #tpu.memory_space<vmem>>, vector<8x16xf32>
    %cst_7 = arith.constant dense<0.000000e+00> : vector<128x16xf32>
    %7 = tpu.matmul %5, %6, %cst_7 {dimension_numbers = #tpu.dot_dimension_numbers<[1], [0], [0], [1], [0, 0, 1, 1], [], []>} : vector<128x8xf32>, vector<8x16xf32>, vector<128x16xf32> -> vector<128x16xf32>
    %c0_8 = arith.constant 0 : index
    %c0_9 = arith.constant 0 : index
    %8 = vector.load %arg2[%c0_8, %c0_9] : memref<128x1xf32, #tpu.memory_space<vmem>>, vector<128x1xf32>
    %9 = vector.broadcast %8 : vector<128x1xf32> to vector<128x16xf32>
    %10 = arith.mulf %3, %9 : vector<128x16xf32>
    %11 = arith.addf %10, %7 : vector<128x16xf32>
    %c0_10 = arith.constant 0 : index
    %c0_11 = arith.constant 0 : index
    %12 = vector.load %arg6[%c0_10, %c0_11] : memref<1x16xf32, #tpu.memory_space<vmem>>, vector<1x16xf32>
    %13 = vector.broadcast %12 : vector<1x16xf32> to vector<128x16xf32>
    %14 = arith.addf %11, %13 : vector<128x16xf32>
    %15 = arith.negf %14 : vector<128x16xf32>
    %16 = math.exp %15 : vector<128x16xf32>
    %cst_12 = arith.constant 1.000000e+00 : f32
    %17 = vector.broadcast %cst_12 : f32 to vector<128x16xf32>
    %18 = arith.addf %17, %16 : vector<128x16xf32>
    %19 = arith.divf %17, %18 : vector<128x16xf32>
    %20 = arith.truncf %19 : vector<128x16xf32> to vector<128x16xbf16>
    %c0_13 = arith.constant 0 : index
    %c0_14 = arith.constant 0 : index
    %21 = vector.load %arg7[%c0_13, %c0_14] : memref<128x16xbf16, #tpu.memory_space<vmem>>, vector<128x16xbf16>
    tpu.vector_store %arg7[%c0_13, %c0_14], %20 {strides = array<i32>} : memref<128x16xbf16, #tpu.memory_space<vmem>>, vector<128x16xbf16>,
    return
  }
  func.func @transform_0(%arg0: i32) -> (i32, i32) {
    %c0_i32 = arith.constant 0 : i32
    %c0_i32_0 = arith.constant 0 : i32
    return %arg0, %c0_i32 : i32, i32
  }
  func.func @transform_1(%arg0: i32) -> (i32, i32) {
    %c0_i32 = arith.constant 0 : i32
    %c0_i32_0 = arith.constant 0 : i32
    return %arg0, %c0_i32 : i32, i32
  }
  func.func @transform_2(%arg0: i32) -> (i32, i32) {
    %c0_i32 = arith.constant 0 : i32
    %c0_i32_0 = arith.constant 0 : i32
    return %arg0, %c0_i32 : i32, i32
  }
  func.func @transform_3(%arg0: i32) -> (i32, i32) {
    %c0_i32 = arith.constant 0 : i32
    %c0_i32_0 = arith.constant 0 : i32
    %c0_i32_1 = arith.constant 0 : i32
    return %c0_i32, %c0_i32_0 : i32, i32
  }
  func.func @transform_4(%arg0: i32) -> (i32, i32) {
    %c0_i32 = arith.constant 0 : i32
    %c0_i32_0 = arith.constant 0 : i32
    %c0_i32_1 = arith.constant 0 : i32
    return %c0_i32, %c0_i32_0 : i32, i32
  }
  func.func @transform_5(%arg0: i32) -> (i32, i32) {
    %c0_i32 = arith.constant 0 : i32
    %c0_i32_0 = arith.constant 0 : i32
    %c0_i32_1 = arith.constant 0 : i32
    return %c0_i32, %c0_i32_0 : i32, i32
  }
  func.func @transform_6(%arg0: i32) -> (i32, i32) {
    %c0_i32 = arith.constant 0 : i32
    %c0_i32_0 = arith.constant 0 : i32
    return %arg0, %c0_i32 : i32, i32
  }
}

</mosaic_0001>

<bundles_post_ra>
// kernel: tpu_custom_call.1
= control target key start
LH: loop header
LB: loop body
LE: loop exit
PB: predicated region body
PF: predicated region fallthrough
CT: control target
= control target key end

     0   :  { %s1582_s21 = smov 0   ;;  %s1797_s0 = inlined_call_operand.vmem [shape: s8[256,256], index: 0, kind: input, shape index: {}]   ;;  %s1798_s1 = inlined_call_operand.vmem [shape: f32[256,1], index: 1, kind: input, shape index: {}]   ;;  %s1799_s2 = inlined_call_operand.vmem [shape: bf16[256,8], index: 2, kind: input, shape index: {}]   ;;  %s1800_s3 = inlined_call_operand.vmem [shape: bf16[256,16], index: 3, kind: input, shape index: {}]   ;;  %s1801_s4 = inlined_call_operand.vmem [shape: f32[8,16], index: 4, kind: input, shape index: {}]   ;;  %s1802_s5 = inlined_call_operand.vmem [shape: f32[1,16], index: 5, kind: input, shape index: {}]   ;;  %s1803_s6 = inlined_call_operand.vmem [shape: bf16[256,16], index: 6, kind: output, shape index: {}]  }
   0x1 LB: > { %s1187_s22 = sadd.s32 4294967295, %s1544_s21   ;;  %p1191_p0 = scmp.ge.s32.totalorder %s1544_s21, 1  ;;  %s1544_s21 = sphi %s1582_s21, %s16_s21  }
   0x2   : > { %p236_p1 = scmp.lt.s32.totalorder %s1544_s21, 3 }
   0x4   : > { %p237_p2 = pnand %p1191_p0, %p236_p1 }
   0x5   : > { %v1458_v0 = vld [vmem:[%s1800_s3 + $0x40] sm:$0xff] (!%p237_p2)   ;;  %s1192_s25 = sshll.u32 (!%p237_p2), %s1187_s22, 2  ;;  %v1460_v2 = vld [vmem:[%s1800_s3 + $0x48] sm:$0xff] (!%p237_p2)   ;;  %v1462_v4 = vld [vmem:[%s1800_s3 + $0x50] sm:$0xff] (!%p237_p2)   ;;  %s1195_s10 = sshll.u32 (!%p237_p2), %s1187_s22, 4  ;;  %v1546_v7 = vmov (!%p237_p2), 0  }
   0x6   : > { %240 = sbr.rel (%p237_p2) target bundleno = 333 (0x14d), region = 44  ;;  %v1459_v1 = vld [vmem:[%s1800_s3] sm:$0xff] (!%p237_p2)   ;;  %p278_p3 = scmp.lt.s32.totalorder (!%p237_p2), %s1192_s25, 7  ;;  %1324 = vmatprep.subr.bf16.mxu0 (!%p237_p2), %v1458_v0  ;;  %1431 = vmatprep.subr.bf16.mxu1 (!%p237_p2), %v1458_v0  ;;  %v1461_v3 = vld [vmem:[%s1800_s3 + $0x8] sm:$0xff] (!%p237_p2)   ;;  %v1463_v5 = vld [vmem:[%s1800_s3 + $0x10] sm:$0xff] (!%p237_p2)   ;;  %vm585_vm0 = vcmask (!%p237_p2), 64512  }
   0x7   : > { %1325 = vmatpush3.bf16.msra.mxu0 (!%p237_p2), %v1459_v1  ;;  %1439 = vmatpush3.bf16.msra.mxu1 (!%p237_p2), %v1459_v1  ;;  %v1464_v6 = vld [vmem:[%s1800_s3 + $0x58] sm:$0xff] (!%p237_p2)   ;;  %p285_p4 = scmp.lt.s32.totalorder (!%p237_p2), %s1195_s10, 31  ;;  %v1466_v9 = vld [vmem:[%s1800_s3 + $0x60] sm:$0xff] (!%p237_p2)   ;;  %v1468_v11 = vld [vmem:[%s1800_s3 + $0x68] sm:$0xff] (!%p237_p2)   ;;  %vm1090_vm1 = vcmask (!%p237_p2), 125952  }
   0x8   : > { %1326 = vmatprep.subr.bf16.mxu0 (!%p237_p2), %v1460_v2  ;;  %1432 = vmatprep.subr.bf16.mxu1 (!%p237_p2), %v1460_v2  ;;  %v1465_v8 = vld [vmem:[%s1800_s3 + $0x18] sm:$0xff] (!%p237_p2)   ;;  %v1467_v10 = vld [vmem:[%s1800_s3 + $0x20] sm:$0xff] (!%p237_p2)   ;;  %v1469_v16 = vld [vmem:[%s1800_s3 + $0x28] sm:$0xff] (!%p237_p2)  }
   0x9   : > { %1456 = vset.pattern.permute.xlu0 (!%p237_p2), %v1546_v7  ;;  %1457 = vset.pattern.permute.xlu1 (!%p237_p2), %v1546_v7  ;;  %v1470_v17 = vld [vmem:[%s1800_s3 + $0x70] sm:$0xff] (!%p237_p2)   ;;  %v1472_v22 = vld [vmem:[%s1800_s3 + $0x78] sm:$0xff] (!%p237_p2)   ;;  %v584_v28 = vld [vmem:[%s1801_s4] sm:$0xff] (!%p237_p2) }
   0xa   : > { %v1471_v20 = vld [vmem:[%s1800_s3 + $0x30] sm:$0xff] (!%p237_p2)   ;;  %v1473_v23 = vld [vmem:[%s1800_s3 + $0x38] sm:$0xff] (!%p237_p2)  }
   0xb   : > { %1327 = vmatpush3.bf16.msra.mxu0 (!%p237_p2), %v1461_v3  ;;  %1440 = vmatpush3.bf16.msra.mxu1 (!%p237_p2), %v1461_v3 }
   0xc   : > { %1328 = vmatprep.subr.bf16.mxu0 (!%p237_p2), %v1462_v4  ;;  %1433 = vmatprep.subr.bf16.mxu1 (!%p237_p2), %v1462_v4 }
   0xd   : > { %s1805_s25 = smov (!%p278_p3, %s1192_s25), 7  ;;  %s1807_s10 = smov (!%p285_p4, %s1195_s10), 31 }
   0xe   : > { %s1268_s15 = sshll.u32 %s1805_s25, 4  ;;  %s1196_s26 = sshll.u32 %s1807_s10, 3 }
   0xf   : > { %1329 = vmatpush3.bf16.msra.mxu0 %v1463_v5  ;;  %1441 = vmatpush3.bf16.msra.mxu1 %v1463_v5  ;;  %s1620_s23 = scalar_lea.vmem %s1797_s0, %s1268_s15  ;;  %s1636_s7 = scalar_lea.vmem %s1798_s1, %s1196_s26 }
  0x10   : > { %1330 = vmatprep.subr.bf16.mxu0 %v1464_v6  ;;  %1434 = vmatprep.subr.bf16.mxu1 %v1464_v6  ;;  %v304_v12 = vld [vmem:[%s1620_s23 + $0x8] sm:$0xff]  ;;  %v310_v13 = vld [vmem:[%s1620_s23 + $0x38] sm:$0xff]  ;;  %v779_v18 = vld [vmem:[%s1636_s7] sm:$0xff]  ;;  %s1198_s22 = sshll.u32 %s1807_s10, 2 }
  0x11   : > { %v312_v14 = vunpack.c.l.s8.bf16 %v304_v12  ;;  %v324_v15 = vunpack.c.l.s8.bf16 %v310_v13  ;;  %797 = vperm.xlu0 %1456, %v779_v18   ;;  %v781_v19 = vld [vmem:[%s1636_s7 + $0x10] sm:$0xff]  ;;  %v780_v21 = vld [vmem:[%s1636_s7 + $0x8] sm:$0xff]  ;;  %v782_v24 = vld [vmem:[%s1636_s7 + $0x18] sm:$0xff]  ;;  %v314_v32 = vunpack.c.h.s8.bf16 %v304_v12  ;;  %v326_v33 = vunpack.c.h.s8.bf16 %v310_v13  ;;  %s1670_s26 = scalar_lea.vmem %s1799_s2, %s1198_s22  ;;  %s1754_s30 = scalar_lea.vmem %s1803_s6, %s1198_s22 }
  0x12   : > { %807 = vperm.xlu1 %1457, %v781_v19   ;;  %v303_v25 = vld [vmem:[%s1620_s23] sm:$0xff]  ;;  %v309_v26 = vld [vmem:[%s1620_s23 + $0x30] sm:$0xff]  ;;  %v784_v31 = vld [vmem:[%s1636_s7 + $0x28] sm:$0xff] }
  0x13   : > { %1331 = vmatpush3.bf16.msra.mxu0 %v1465_v8  ;;  %1442 = vmatpush3.bf16.msra.mxu1 %v1465_v8  ;;  %v783_v27 = vld [vmem:[%s1636_s7 + $0x20] sm:$0xff]  ;;  %v311_v29 = vunpack.c.l.s8.bf16 %v303_v25  ;;  %v323_v30 = vunpack.c.l.s8.bf16 %v309_v26  ;;  %v785_v34 = vld [vmem:[%s1636_s7 + $0x30] sm:$0xff]  ;;  %v786_v35 = vld [vmem:[%s1636_s7 + $0x38] sm:$0xff]  ;;  %v313_v39 = vunpack.c.h.s8.bf16 %v303_v25  ;;  %v325_v40 = vunpack.c.h.s8.bf16 %v309_v26 }
  0x14   : > { %1332 = vmatprep.subr.bf16.mxu0 %v1466_v9  ;;  %1435 = vmatprep.subr.bf16.mxu1 %v1466_v9  ;;  %v306_v36 = vld [vmem:[%s1620_s23 + $0x18] sm:$0xff]  ;;  %v1286_v37 = vld [vmem:[%s1670_s26] sm:$0xff]   ;;  %v788_v41 = vld [vmem:[%s1636_s7 + $0x48] sm:$0xff] }
  0x15   : > { %487 = vmatprep.mubr.bf16.mxu0 %v312_v14  ;;  %535 = vmatprep.mubr.bf16.mxu1 %v324_v15  ;;  %v787_v38 = vld [vmem:[%s1636_s7 + $0x40] sm:$0xff]  ;;  %v316_v42 = vunpack.c.l.s8.bf16 %v306_v36  ;;  %v1287_v43 = vunpack.c.l.bf16 %v1286_v37  ;;  %v789_v44 = vld [vmem:[%s1636_s7 + $0x50] sm:$0xff]  ;;  %v790_v45 = vld [vmem:[%s1636_s7 + $0x58] sm:$0xff]  ;;  %v1288_v49 = vunpack.c.h.bf16 %v1286_v37  ;;  %v318_v53 = vunpack.c.h.s8.bf16 %v306_v36 }
  0x16   : > { %802 = vperm.xlu0 %1456, %v780_v21   ;;  %812 = vperm.xlu1 %1457, %v782_v24   ;;  %v305_v46 = vld [vmem:[%s1620_s23 + $0x10] sm:$0xff]  ;;  %v1317_v47 = vld [vmem:[%s1670_s26 + $0x8] sm:$0xff]   ;;  %v791_v48 = vld [vmem:[%s1636_s7 + $0x60] sm:$0xff] }
  0x17   : > { %1333 = vmatpush3.bf16.msra.mxu0 %v1467_v10  ;;  %1443 = vmatpush3.bf16.msra.mxu1 %v1467_v10  ;;  %v315_v50 = vunpack.c.l.s8.bf16 %v305_v46  ;;  %v792_v51 = vld [vmem:[%s1636_s7 + $0x68] sm:$0xff]  ;;  %v1291_v52 = vunpack.c.l.bf16 %v1317_v47  ;;  %v1318_v54 = vld [vmem:[%s1670_s26 + $0x10] sm:$0xff]   ;;  %v1292_v56 = vunpack.c.h.bf16 %v1317_v47  ;;  %v794_v57 = vld [vmem:[%s1636_s7 + $0x78] sm:$0xff]  ;;  %v317_v61 = vunpack.c.h.s8.bf16 %v305_v46 }
  0x18   : > { %1334 = vmatprep.subr.bf16.mxu0 %v1468_v11  ;;  %1436 = vmatprep.subr.bf16.mxu1 %v1468_v11  ;;  %v793_v55 = vld [vmem:[%s1636_s7 + $0x70] sm:$0xff]  ;;  %v1295_v58 = vunpack.c.l.bf16 %v1318_v54  ;;  %v1319_v59 = vld [vmem:[%s1670_s26 + $0x18] sm:$0xff]   ;;  %v308_v60 = vld [vmem:[%s1620_s23 + $0x28] sm:$0xff]  ;;  %v1296_v62 = vunpack.c.h.bf16 %v1318_v54 }
  0x19   : > { %v1299_v63 = vunpack.c.l.bf16 %v1319_v59  ;;  %v320_v0 = vunpack.c.l.s8.bf16 %v308_v60  ;;  %v1320_v1 = vld [vmem:[%s1670_s26 + $0x20] sm:$0xff]   ;;  %v1300_v2 = vunpack.c.h.bf16 %v1319_v59  ;;  %v1321_v5 = vld [vmem:[%s1670_s26 + $0x28] sm:$0xff]   ;;  %v322_v9 = vunpack.c.h.s8.bf16 %v308_v60  ;;  %v1322_v10 = vld [vmem:[%s1670_s26 + $0x30] sm:$0xff]  }
  0x1a   : > { %817 = vperm.xlu0 %1456, %v783_v27   ;;  %822 = vperm.xlu1 %1457, %v784_v31   ;;  %v1303_v3 = vunpack.c.l.bf16 %v1320_v1  ;;  %v307_v4 = vld [vmem:[%s1620_s23 + $0x20] sm:$0xff]  ;;  %v1304_v7 = vunpack.c.h.bf16 %v1320_v1  ;;  %v1307_v8 = vunpack.c.l.bf16 %v1321_v5  ;;  %v1308_v11 = vunpack.c.h.bf16 %v1321_v5  ;;  %v1323_v13 = vld [vmem:[%s1670_s26 + $0x38] sm:$0xff]  }
  0x1b   : > { %1335 = vmatpush3.bf16.msra.mxu0 %v1469_v16  ;;  %1444 = vmatpush3.bf16.msra.mxu1 %v1469_v16  ;;  %v319_v6 = vunpack.c.l.s8.bf16 %v307_v4  ;;  %v1311_v12 = vunpack.c.l.bf16 %v1322_v10  ;;  %v321_v14 = vunpack.c.h.s8.bf16 %v307_v4  ;;  %v1312_v15 = vunpack.c.h.bf16 %v1322_v10 }
  0x1c   : > { %1336 = vmatprep.subr.bf16.mxu0 %v1470_v17  ;;  %1437 = vmatprep.subr.bf16.mxu1 %v1470_v17  ;;  %v1315_v16 = vunpack.c.l.bf16 %v1323_v13  ;;  %v1316_v17 = vunpack.c.h.bf16 %v1323_v13 }
  0x1e   : > { %827 = vperm.xlu0 %1456, %v785_v34   ;;  %832 = vperm.xlu1 %1457, %v786_v35  }
  0x1f   : > { %1337 = vmatpush3.bf16.msra.mxu0 %v1471_v20  ;;  %1445 = vmatpush3.bf16.msra.mxu1 %v1471_v20 }
  0x20   : > { %1338 = vmatprep.subr.bf16.mxu0 %v1472_v22  ;;  %1438 = vmatprep.subr.bf16.mxu1 %v1472_v22 }
  0x22   : > { %837 = vperm.xlu0 %1456, %v787_v38   ;;  %842 = vperm.xlu1 %1457, %v788_v41  }
  0x23   : > { %1339 = vmatpush3.bf16.msra.mxu0 %v1473_v23  ;;  %1446 = vmatpush3.bf16.msra.mxu1 %v1473_v23 }
  0x24   : > { %1405 = vmatprep.subr.mxu1 %v584_v28 }
  0x26   : > { %488 = vmatmul.mubr.bf16.vlgmr.msra.gmra.mrb[0].mxu0 %v311_v29  ;;  %536 = vmatmul.mubr.bf16.vlgmr.msra.gmra.mrb[0].mxu1 %v323_v30 }
  0x27   : > { %1406 = vmatpush3.msra.mxu1 %v584_v28  ;;  %495 = vmatprep.mubr.bf16.mxu0 %v314_v32 }
  0x28   : > { %543 = vmatprep.mubr.bf16.mxu1 %v326_v33  ;;  %847 = vperm.xlu0 %1456, %v789_v44  }
  0x29   : > { %852 = vperm.xlu1 %1457, %v790_v45  }
  0x2c   : > { %857 = vperm.xlu0 %1456, %v791_v48  }
  0x2d   : > { %862 = vperm.xlu1 %1457, %v792_v51  }
  0x2e   : > { %496 = vmatmul.mubr.bf16.gmra.mrb[4].mxu0 %v313_v39  ;;  %544 = vmatmul.mubr.bf16.gmra.mrb[4].mxu1 %v325_v40 }
  0x2f   : > { %503 = vmatprep.mubr.bf16.mxu0 %v316_v42  ;;  %1407 = vmatprep.mubr.msk.f32.mxu1 %vm585_vm0, %v1287_v43 }
  0x30   : > { %867 = vperm.xlu0 %1456, %v793_v55  }
  0x31   : > { %872 = vperm.xlu1 %1457, %v794_v57  }
  0x36   : > { %504 = vmatmul.mubr.bf16.gmra.mrb[8].mxu0 %v315_v50  ;;  %1408 = vmatmul.mubr.msk.f32.vlgmr.msra.gmra.mrb[8].mxu1 %vm585_vm0, %v1288_v49 }
  0x37   : > { %1410 = vmatprep.mubr.msk.f32.mxu1 %vm585_vm0, %v1291_v52  ;;  %511 = vmatprep.mubr.bf16.mxu0 %v318_v53  ;;  %v1721_v53 = vld [vmem:[%s1802_s5] ss:$0 sm:$0xff] }
  0x3a   : > { %1411 = vmatmul.mubr.msk.f32.gmra.mrb[10].mxu1 %vm585_vm0, %v1292_v56 }
  0x3b   : > { %1413 = vmatprep.mubr.msk.f32.mxu1 %vm585_vm0, %v1295_v58 }
  0x3e   : > { %512 = vmatmul.mubr.bf16.gmra.mrb[12].mxu0 %v317_v61  ;;  %1414 = vmatmul.mubr.msk.f32.gmra.mrb[12].mxu1 %vm585_vm0, %v1296_v62 }
  0x3f   : > { %1416 = vmatprep.mubr.msk.f32.mxu1 %vm585_vm0, %v1299_v63  ;;  %519 = vmatprep.mubr.bf16.mxu0 %v320_v0 }
  0x42   : > { %1417 = vmatmul.mubr.msk.f32.gmra.mrb[14].mxu1 %vm585_vm0, %v1300_v2 }
  0x43   : > { %1419 = vmatprep.mubr.msk.f32.mxu1 %vm585_vm0, %v1303_v3 }
  0x46   : > { %520 = vmatmul.mubr.bf16.gmra.mrb[16].mxu0 %v319_v6  ;;  %1420 = vmatmul.mubr.msk.f32.gmra.mrb[16].mxu1 %vm585_vm0, %v1304_v7 }
  0x47   : > { %1422 = vmatprep.mubr.msk.f32.mxu1 %vm585_vm0, %v1307_v8  ;;  %527 = vmatprep.mubr.bf16.mxu0 %v322_v9 }
  0x4a   : > { %1423 = vmatmul.mubr.msk.f32.gmra.mrb[18].mxu1 %vm585_vm0, %v1308_v11 }
  0x4b   : > { %1425 = vmatprep.mubr.msk.f32.mxu1 %vm585_vm0, %v1311_v12 }
  0x4e   : > { %528 = vmatmul.mubr.bf16.gmra.mrb[20].mxu0 %v321_v14  ;;  %1426 = vmatmul.mubr.msk.f32.gmra.mrb[20].mxu1 %vm585_vm0, %v1312_v15 }
  0x4f   : > { %1428 = vmatprep.mubr.msk.f32.mxu1 %vm585_vm0, %v1315_v16 }
  0x52   : > { %1429 = vmatmul.mubr.msk.f32.gmra.mrb[22].mxu1 %vm585_vm0, %v1316_v17 }
  0x90   : > { %v798_v18 = vpop.permute.xlu0 %797 }
  0x91   : > { %v808_v19 = vpop.permute.xlu1 %807 }
  0x95   : > { %v803_v20 = vpop.permute.xlu0 %802  ;;  %v813_v21 = vpop.permute.xlu1 %812 }
  0x99   : > { %v818_v34 = vpop.permute.xlu0 %817  ;;  %v823_v35 = vpop.permute.xlu1 %822 }
  0x9d   : > { %v828_v48 = vpop.permute.xlu0 %827  ;;  %v833_v49 = vpop.permute.xlu1 %832 }
  0xa1   : > { %v838_v7 = vpop.permute.xlu0 %837  ;;  %v1725_v11 = vpop.permute.xlu1 %842 }
  0xf9   : > { %v1340_v22 = vpop.f32.mrb[0].mxu0  ;;  %v1376_v23 = vpop.f32.mrb[0].mxu1 }
  0xfa   : > { %v1341_v24 = vpop.f32.mrb[1].mxu0  ;;  %v1377_v25 = vpop.f32.mrb[1].mxu1 }
  0xfb   : > { %v1342_v26 = vadd.f32 %v1341_v24, %v1340_v22  ;;  %v1710_v27 = vadd.f32 %v1377_v25, %v1376_v23  ;;  %v1343_v28 = vpop.f32.mrb[2].mxu0  ;;  %v1379_v29 = vpop.f32.mrb[2].mxu1 }
  0xfc   : > { %v1344_v30 = vpop.f32.mrb[3].mxu0  ;;  %v1380_v31 = vpop.f32.mrb[3].mxu1 }
  0xfd   : > { %v1345_v32 = vadd.f32 %v1344_v30, %v1343_v28  ;;  %v1712_v33 = vadd.f32 %v1380_v31, %v1379_v29  ;;  %v875_v54 = vmul.f32 %v1342_v26, %v798_v18  ;;  %v1730_v28 = vpop.permute.xlu0 %847 }
  0xff   : > { %v876_v50 = vmul.f32 %v1345_v32, %v803_v20 }
 0x101   : > { %v1346_v36 = vpop.f32.mrb[4].mxu0  ;;  %v1382_v37 = vpop.f32.mrb[4].mxu1 }
 0x102   : > { %v1347_v38 = vpop.f32.mrb[5].mxu0  ;;  %v1383_v39 = vpop.f32.mrb[5].mxu1 }
 0x103   : > { %v1348_v40 = vadd.f32 %v1347_v38, %v1346_v36  ;;  %v1714_v41 = vadd.f32 %v1383_v39, %v1382_v37  ;;  %v1349_v42 = vpop.f32.mrb[6].mxu0  ;;  %v1385_v43 = vpop.f32.mrb[6].mxu1 }
 0x104   : > { %v1350_v44 = vpop.f32.mrb[7].mxu0  ;;  %v1386_v45 = vpop.f32.mrb[7].mxu1 }
 0x105   : > { %v1351_v46 = vadd.f32 %v1350_v44, %v1349_v42  ;;  %v1716_v47 = vadd.f32 %v1386_v45, %v1385_v43  ;;  %v877_v3 = vmul.f32 %v1348_v40, %v808_v19 }
 0x107   : > { %v878_v63 = vmul.f32 %v1351_v46, %v813_v21 }
 0x109   : > { %v1352_v51 = vpop.f32.mrb[8].mxu0  ;;  %v1409_v52 = vpop.f32.mrb[8].mxu1 }
 0x10a   : > { %v892_v55 = vadd.f32 %v1409_v52, %v876_v50  ;;  %v1353_v56 = vpop.f32.mrb[9].mxu0  ;;  %v700_v57 = vpop.f32.mrb[9].mxu1 }
 0x10b   : > { %v1354_v58 = vadd.f32 %v1353_v56, %v1352_v51  ;;  %v891_v59 = vadd.f32 %v875_v54, %v700_v57  ;;  %v1355_v60 = vpop.f32.mrb[10].mxu0  ;;  %v858_v52 = vpop.permute.xlu0 %857 }
 0x10c   : > { %v915_v61 = vadd.f32 %v1721_v53, %v892_v55  ;;  %v1356_v62 = vpop.f32.mrb[11].mxu0 }
 0x10d   : > { %v914_v0 = vadd.f32 %v1721_v53, %v891_v59  ;;  %v1357_v1 = vadd.f32 %v1356_v62, %v1355_v60  ;;  %v1412_v2 = vpop.f32.mrb[10].mxu1  ;;  %v879_v16 = vmul.f32 %v1354_v58, %v818_v34  ;;  %v1733_v34 = vpop.permute.xlu1 %852 }
 0x10e   : > { %v1235_v4 = vmul.f32 -1.442695, %v915_v61  ;;  %v894_v5 = vadd.f32 %v1412_v2, %v878_v63  ;;  %v710_v6 = vpop.f32.mrb[11].mxu1 }
 0x10f   : > { %v1234_v8 = vmul.f32 -1.442695, %v914_v0  ;;  %v893_v9 = vadd.f32 %v877_v3, %v710_v6  ;;  %v880_v10 = vmul.f32 %v1357_v1, %v823_v35  ;;  %v868_v3 = vpop.permute.xlu0 %867 }
 0x110   : > { %1474 = vpow2.f32 %v1235_v4  ;;  %v917_v12 = vadd.f32 %v1721_v53, %v894_v5 }
 0x111   : > { %1476 = vpow2.f32 %v1234_v8  ;;  %v916_v13 = vadd.f32 %v1721_v53, %v893_v9  ;;  %v1358_v14 = vpop.f32.mrb[12].mxu0  ;;  %v1415_v15 = vpop.f32.mrb[12].mxu1 }
 0x112   : > { %v1237_v17 = vmul.f32 -1.442695, %v917_v12  ;;  %v896_v18 = vadd.f32 %v1415_v15, %v880_v10  ;;  %v1359_v19 = vpop.f32.mrb[13].mxu0  ;;  %v720_v20 = vpop.f32.mrb[13].mxu1 }
 0x113   : > { %v1236_v21 = vmul.f32 -1.442695, %v916_v13  ;;  %v1360_v22 = vadd.f32 %v1359_v19, %v1358_v14  ;;  %v895_v23 = vadd.f32 %v879_v16, %v720_v20  ;;  %v1361_v24 = vpop.f32.mrb[14].mxu0  ;;  %v863_v57 = vpop.permute.xlu1 %862  ;;  %v887_v16 = vmul.f32 %v1710_v27, %v858_v52 }
 0x114   : > { %1478 = vpow2.f32 %v1237_v17  ;;  %v919_v25 = vadd.f32 %v1721_v53, %v896_v18  ;;  %v1362_v26 = vpop.f32.mrb[15].mxu0  ;;  %v888_v8 = vmul.f32 %v1712_v33, %v863_v57  ;;  %v889_v17 = vmul.f32 %v1714_v41, %v868_v3 }
 0x115   : > { %1480 = vpow2.f32 %v1236_v21  ;;  %v918_v29 = vadd.f32 %v1721_v53, %v895_v23  ;;  %v1363_v30 = vadd.f32 %v1362_v26, %v1361_v24  ;;  %v1418_v31 = vpop.f32.mrb[14].mxu1  ;;  %v881_v32 = vmul.f32 %v1360_v22, %v828_v48 }
 0x116   : > { %v1239_v35 = vmul.f32 -1.442695, %v919_v25  ;;  %v730_v36 = vpop.f32.mrb[15].mxu1 }
 0x117   : > { %v1238_v37 = vmul.f32 -1.442695, %v918_v29  ;;  %v882_v38 = vmul.f32 %v1363_v30, %v833_v49  ;;  %v897_v39 = vadd.f32 %v881_v32, %v730_v36  ;;  %v873_v9 = vpop.permute.xlu1 %872 }
 0x118   : > { %1482 = vpow2.f32 %v1239_v35  ;;  %v890_v25 = vmul.f32 %v1716_v47, %v873_v9 }
 0x119   : > { %1484 = vpow2.f32 %v1238_v37  ;;  %v898_v40 = vadd.f32 %v1418_v31, %v882_v38  ;;  %v920_v42 = vadd.f32 %v1721_v53, %v897_v39  ;;  %v1364_v43 = vpop.f32.mrb[16].mxu0  ;;  %v1421_v44 = vpop.f32.mrb[16].mxu1 }
 0x11a   : > { %v1475_v45 = vpop.eup %1474  ;;  %v1365_v46 = vpop.f32.mrb[17].mxu0 }
 0x11b   : > { %v740_v50 = vpop.f32.mrb[17].mxu1  ;;  %v1477_v51 = vpop.eup %1476  ;;  %v979_v48 = vadd.f32 1.0, %v1475_v45  ;;  %v921_v54 = vadd.f32 %v1721_v53, %v898_v40  ;;  %v1366_v55 = vadd.f32 %v1365_v46, %v1364_v43  ;;  %v1240_v58 = vmul.f32 -1.442695, %v920_v42 }
 0x11c   : > { %v1367_v56 = vpop.f32.mrb[18].mxu0  ;;  %v978_v49 = vadd.f32 1.0, %v1477_v51 }
 0x11d   : > { %v1368_v59 = vpop.f32.mrb[19].mxu0  ;;  %1486 = vrcp.f32 %v979_v48  ;;  %v1241_v60 = vmul.f32 -1.442695, %v921_v54  ;;  %v883_v61 = vmul.f32 %v1366_v55, %v838_v7  ;;  %v1737_v63 = vpop.f32.mrb[18].mxu1 }
 0x11e   : > { %v1369_v62 = vadd.f32 %v1368_v59, %v1367_v56  ;;  %v1479_v0 = vpop.eup %1478  ;;  %1488 = vrcp.f32 %v978_v49  ;;  %v750_v1 = vpop.f32.mrb[19].mxu1 }
 0x11f   : > { %v1481_v2 = vpop.eup %1480  ;;  %v981_v4 = vadd.f32 1.0, %v1479_v0  ;;  %1490 = vpow2.f32 %v1241_v60  ;;  %v899_v5 = vadd.f32 %v883_v61, %v740_v50 }
 0x120   : > { %v884_v6 = vmul.f32 %v1369_v62, %v1725_v11  ;;  %v980_v10 = vadd.f32 1.0, %v1481_v2  ;;  %1492 = vpow2.f32 %v1240_v58 }
 0x121   : > { %1494 = vrcp.f32 %v981_v4  ;;  %v922_v7 = vadd.f32 %v1721_v53, %v899_v5  ;;  %v1370_v13 = vpop.f32.mrb[20].mxu0  ;;  %v1427_v14 = vpop.f32.mrb[20].mxu1 }
 0x122   : > { %v900_v12 = vadd.f32 %v1421_v44, %v884_v6  ;;  %v1483_v15 = vpop.eup %1482  ;;  %1496 = vrcp.f32 %v980_v10  ;;  %v904_v18 = vadd.f32 %v1427_v14, %v888_v8  ;;  %v1371_v11 = vpop.f32.mrb[21].mxu0 }
 0x123   : > { %v760_v19 = vpop.f32.mrb[21].mxu1  ;;  %v1485_v33 = vpop.eup %1484  ;;  %v983_v20 = vadd.f32 1.0, %v1483_v15  ;;  %v1242_v21 = vmul.f32 -1.442695, %v922_v7  ;;  %v1372_v23 = vadd.f32 %v1371_v11, %v1370_v13 }
 0x124   : > { %v923_v22 = vadd.f32 %v1721_v53, %v900_v12  ;;  %v1373_v24 = vpop.f32.mrb[22].mxu0  ;;  %v982_v26 = vadd.f32 1.0, %v1485_v33  ;;  %v927_v29 = vadd.f32 %v1721_v53, %v904_v18  ;;  %v903_v27 = vadd.f32 %v887_v16, %v760_v19 }
 0x125   : > { %v1374_v30 = vpop.f32.mrb[23].mxu0  ;;  %1498 = vrcp.f32 %v983_v20  ;;  %v885_v31 = vmul.f32 %v1372_v23, %v1730_v28  ;;  %v1430_v35 = vpop.f32.mrb[22].mxu1 }
 0x126   : > { %v1243_v41 = vmul.f32 -1.442695, %v923_v22  ;;  %v1375_v32 = vadd.f32 %v1374_v30, %v1373_v24  ;;  %1500 = vrcp.f32 %v982_v26  ;;  %v1247_v36 = vmul.f32 -1.442695, %v927_v29  ;;  %v770_v39 = vpop.f32.mrb[23].mxu1 }
 0x127   : > { %v926_v37 = vadd.f32 %v1721_v53, %v903_v27  ;;  %v906_v38 = vadd.f32 %v1430_v35, %v890_v25  ;;  %v1487_v40 = vpop.eup %1486  ;;  %1502 = vpow2.f32 %v1242_v21  ;;  %v901_v47 = vadd.f32 %v885_v31, %v750_v1 }
 0x128   : > { %v886_v28 = vmul.f32 %v1375_v32, %v1733_v34  ;;  %v905_v42 = vadd.f32 %v889_v17, %v770_v39  ;;  %v1489_v43 = vpop.eup %1488  ;;  %v1270_v44 = vpack.c.bf16 %v1487_v40, %v1487_v40  ;;  %1504 = vpow2.f32 %v1243_v41 }
 0x129   : > { %v1246_v45 = vmul.f32 -1.442695, %v926_v37  ;;  %v929_v46 = vadd.f32 %v1721_v53, %v906_v38  ;;  %v1491_v50 = vpop.eup %1490  ;;  %v1269_v51 = vpack.c.bf16 %v1489_v43, %v1489_v43  ;;  %1506 = vpow2.f32 %v1247_v36 }
 0x12a   : > { %v924_v52 = vadd.f32 %v1721_v53, %v901_v47  ;;  %v902_v48 = vadd.f32 %v1737_v63, %v886_v28  ;;  %v1493_v54 = vpop.eup %1492  ;;  %1092 = vst.msk [vmem:[%s1754_s30 + $0x4] sm:$0xf] %vm1090_vm1, %v1270_v44  ;;  %v985_v55 = vadd.f32 1.0, %v1491_v50  ;;  %v928_v34 = vadd.f32 %v1721_v53, %v905_v42 }
 0x12b   : > { %1508 = vpow2.f32 %v1246_v45  ;;  %v1495_v56 = vpop.eup %1494  ;;  %1091 = vst.msk [vmem:[%s1754_s30] sm:$0xf] %vm1090_vm1, %v1269_v51  ;;  %v984_v57 = vadd.f32 1.0, %v1493_v54  ;;  %v1249_v61 = vmul.f32 -1.442695, %v929_v46 }
 0x12c   : > { %v1244_v49 = vmul.f32 -1.442695, %v924_v52  ;;  %v925_v58 = vadd.f32 %v1721_v53, %v902_v48  ;;  %v1497_v59 = vpop.eup %1496  ;;  %v1272_v60 = vpack.c.bf16 %v1495_v56, %v1495_v56  ;;  %1510 = vrcp.f32 %v985_v55 }
 0x12d   : > { %v1271_v62 = vpack.c.bf16 %v1497_v59, %v1497_v59  ;;  %1512 = vrcp.f32 %v984_v57  ;;  %v1248_v0 = vmul.f32 -1.442695, %v928_v34 }
 0x12e   : > { %v1245_v63 = vmul.f32 -1.442695, %v925_v58  ;;  %1094 = vst.msk [vmem:[%s1754_s30 + $0xc] sm:$0xf] %vm1090_vm1, %v1272_v60  ;;  %1514 = vpow2.f32 %v1244_v49 }
 0x12f   : > { %v1499_v1 = vpop.eup %1498  ;;  %1093 = vst.msk [vmem:[%s1754_s30 + $0x8] sm:$0xf] %vm1090_vm1, %v1271_v62 }
 0x130   : > { %1516 = vpow2.f32 %v1245_v63  ;;  %v1501_v2 = vpop.eup %1500  ;;  %v1274_v3 = vpack.c.bf16 %v1499_v1, %v1499_v1 }
 0x131   : > { %1518 = vpow2.f32 %v1249_v61  ;;  %v1503_v53 = vpop.eup %1502  ;;  %v1273_v4 = vpack.c.bf16 %v1501_v2, %v1501_v2 }
 0x132   : > { %1520 = vpow2.f32 %v1248_v0  ;;  %v1505_v5 = vpop.eup %1504  ;;  %1096 = vst.msk [vmem:[%s1754_s30 + $0x14] sm:$0xf] %vm1090_vm1, %v1274_v3  ;;  %v986_v6 = vadd.f32 1.0, %v1503_v53 }
 0x133   : > { %v1507_v8 = vpop.eup %1506  ;;  %1095 = vst.msk [vmem:[%s1754_s30 + $0x10] sm:$0xf] %vm1090_vm1, %v1273_v4  ;;  %v987_v9 = vadd.f32 1.0, %v1505_v5 }
 0x134   : > { %1522 = vrcp.f32 %v986_v6  ;;  %v991_v7 = vadd.f32 1.0, %v1507_v8 }
 0x135   : > { %v1509_v10 = vpop.eup %1508  ;;  %1524 = vrcp.f32 %v987_v9 }
 0x136   : > { %v990_v12 = vadd.f32 1.0, %v1509_v10  ;;  %v1511_v13 = vpop.eup %1510  ;;  %1526 = vrcp.f32 %v991_v7 }
 0x137   : > { %v1513_v14 = vpop.eup %1512  ;;  %v1276_v15 = vpack.c.bf16 %v1511_v13, %v1511_v13 }
 0x138   : > { %1528 = vrcp.f32 %v990_v12  ;;  %v1515_v16 = vpop.eup %1514  ;;  %v1275_v17 = vpack.c.bf16 %v1513_v14, %v1513_v14 }
 0x139   : > { %1098 = vst.msk [vmem:[%s1754_s30 + $0x1c] sm:$0xf] %vm1090_vm1, %v1276_v15  ;;  %v988_v11 = vadd.f32 1.0, %v1515_v16 }
 0x13a   : > { %v1517_v18 = vpop.eup %1516  ;;  %1097 = vst.msk [vmem:[%s1754_s30 + $0x18] sm:$0xf] %vm1090_vm1, %v1275_v17 }
 0x13b   : > { %v1519_v19 = vpop.eup %1518  ;;  %v989_v33 = vadd.f32 1.0, %v1517_v18  ;;  %1530 = vrcp.f32 %v988_v11 }
 0x13c   : > { %v1521_v20 = vpop.eup %1520  ;;  %v993_v21 = vadd.f32 1.0, %v1519_v19 }
 0x13d   : > { %1532 = vrcp.f32 %v989_v33  ;;  %v992_v22 = vadd.f32 1.0, %v1521_v20 }
 0x13e   : > { %1534 = vrcp.f32 %v993_v21  ;;  %v1523_v23 = vpop.eup %1522 }
 0x13f   : > { %1536 = vrcp.f32 %v992_v22  ;;  %v1525_v24 = vpop.eup %1524  ;;  %v1277_v25 = vpack.c.bf16 %v1523_v23, %v1523_v23 }
 0x140   : > { %v1527_v26 = vpop.eup %1526  ;;  %v1278_v29 = vpack.c.bf16 %v1525_v24, %v1525_v24 }
 0x141   : > { %1099 = vst.msk [vmem:[%s1754_s30 + $0x20] sm:$0xf] %vm1090_vm1, %v1277_v25  ;;  %v1282_v30 = vpack.c.bf16 %v1527_v26, %v1527_v26 }
 0x142   : > { %v1529_v27 = vpop.eup %1528  ;;  %1100 = vst.msk [vmem:[%s1754_s30 + $0x24] sm:$0xf] %vm1090_vm1, %v1278_v29 }
 0x143   : > { %v1281_v41 = vpack.c.bf16 %v1529_v27, %v1529_v27  ;;  %1104 = vst.msk [vmem:[%s1754_s30 + $0x34] sm:$0xf] %vm1090_vm1, %v1282_v30 }
 0x145   : > { %1103 = vst.msk [vmem:[%s1754_s30 + $0x30] sm:$0xf] %vm1090_vm1, %v1281_v41  ;;  %v1531_v31 = vpop.eup %1530 }
 0x146   : > { %v1279_v35 = vpack.c.bf16 %v1531_v31, %v1531_v31 }
 0x147   : > { %v1533_v32 = vpop.eup %1532 }
 0x148   : > { %v1535_v36 = vpop.eup %1534  ;;  %v1280_v37 = vpack.c.bf16 %v1533_v32, %v1533_v32  ;;  %1101 = vst.msk [vmem:[%s1754_s30 + $0x28] sm:$0xf] %vm1090_vm1, %v1279_v35 }
 0x149   : > { %v1537_v38 = vpop.eup %1536  ;;  %v1284_v39 = vpack.c.bf16 %v1535_v36, %v1535_v36 }
 0x14a   : > { %1102 = vst.msk [vmem:[%s1754_s30 + $0x2c] sm:$0xf] %vm1090_vm1, %v1280_v37  ;;  %v1283_v40 = vpack.c.bf16 %v1537_v38, %v1537_v38 }
 0x14b   : > { %1106 = vst.msk [vmem:[%s1754_s30 + $0x3c] sm:$0xf] %vm1090_vm1, %v1284_v39 }
 0x14c   : > { %1105 = vst.msk [vmem:[%s1754_s30 + $0x38] sm:$0xf] %vm1090_vm1, %v1283_v40 }
 0x14d PF: > { %s16_s21 = sadd.s32 1, %s1544_s21  }
 0x14e   : > { %p13_p5 = scmp.ge.s32.totalorder %s16_s21, 4  }
 0x150   :  { %15 = sbr.rel (!%p13_p5) target bundleno = 1 (0x1), region = 80 }

</bundles_post_ra>
